<compile_context>
chip_gen: v7x
topology: tpu7x:2x2x1
jax: 0.10.0
libtpu: 0.0.40
codegen_flags: <defaults>
</compile_context>

<pallas_src>
import functools

import jax
import jax.numpy as jnp
from jax.experimental import pallas as pl
from jax.experimental.pallas import tpu as pltpu

LANE = 128
DEFAULT_TILE_B = 2048          # sweep 1024-4096 for large-batch throughput


def _round_up(x, m):
    return ((x + m - 1) // m) * m


def _tiled_index_map(i):
    # Batch-tiled operands (x, out): block (i, 0).
    return (i, 0)


def _resident_index_map(i):
    # Weights / biases: always block (0, 0) -> DMA'd once, resident in VMEM.
    return (0, 0)


def mlp_kernel(x_ref,
               w1_ref, b1_ref,
               w2_ref, b2_ref,
               w3_ref, b3_ref,
               w4_ref, b4_ref,
               w5_ref, b5_ref,
               o_ref):
    # x_ref: (TILE_B, in_dim) float32 tile -> cast to bf16 on the VPU here
    # (cheap, hidden under DMA/MXU) instead of a separate XLA pass over HBM.
    h = x_ref[...].astype(jnp.bfloat16)

    def layer(h, w_ref, b_ref, relu):
        acc = jnp.dot(h, w_ref[...], preferred_element_type=jnp.float32)
        acc = acc + b_ref[...]
        if relu:
            acc = jnp.maximum(acc, 0.0)
        return acc

    h = layer(h, w1_ref, b1_ref, True).astype(jnp.bfloat16)
    h = layer(h, w2_ref, b2_ref, True).astype(jnp.bfloat16)
    h = layer(h, w3_ref, b3_ref, True).astype(jnp.bfloat16)
    h = layer(h, w4_ref, b4_ref, True).astype(jnp.bfloat16)
    h = layer(h, w5_ref, b5_ref, False)          # final layer: no activation

    o_ref[...] = h.astype(o_ref.dtype)           # lane-dense (TILE_B, 128) store


def prepare_params(params):
    """One-time parameter prep (do NOT call per forward pass).

    Pads the final layer to a 128-lane slab (lane-dense output store), casts
    weights to bf16 (in,out) and biases to f32 (1,out).  Returns the prepared
    list and the true output_dim.
    """
    out_dim = params[-1][0].shape[1]
    out_pad = _round_up(out_dim, LANE)
    prepared = []
    n = len(params)
    for li, (w, b) in enumerate(params):
        if li == n - 1 and out_pad != out_dim:
            w = jnp.pad(w, ((0, 0), (0, out_pad - out_dim)))
            b = jnp.pad(b, ((0, 0), (0, out_pad - out_dim)))
        prepared.append((jnp.asarray(w, jnp.bfloat16), jnp.asarray(b, jnp.float32)))
    return prepared, out_dim


def _choose_tile_b(batch, tile_b):
    # Keep >= 2 grid steps when the batch allows it so v7x's two TensorCores
    # both get work; round to 16 rows (bf16 packs 16 rows per vreg).
    tile_b = min(tile_b, max(16, _round_up(pl.cdiv(batch, 2), 16)))
    tile_b = _round_up(tile_b, 16)
    tile_b = min(tile_b, _round_up(batch, 8))     # never bigger than needed
    return max(tile_b, 8)


def fully_connected_network(x, prepared_params, out_dim, *,
                            tile_b=DEFAULT_TILE_B, out_dtype=jnp.float32):
    """x: (batch, input_dim) float32.
    prepared_params: output of prepare_params() — bf16 W (in,out), f32 b (1,out),
    final layer already padded to 128 lanes."""
    batch, in_dim = x.shape
    out_pad = prepared_params[-1][0].shape[1]

    tile_b = _choose_tile_b(batch, tile_b)
    n_tiles = pl.cdiv(batch, tile_b)              # ragged last block is masked

    flat_args = [x]
    for w, b in prepared_params:
        flat_args.append(w)
        flat_args.append(b)

    in_specs = [pl.BlockSpec((tile_b, in_dim), _tiled_index_map)]
    for a in flat_args[1:]:
        in_specs.append(pl.BlockSpec(a.shape, _resident_index_map))
    out_spec = pl.BlockSpec((tile_b, out_pad), _tiled_index_map)

    # --- Cost estimate for XLA's scheduler. ---
    dims = [in_dim] + [w.shape[1] for w, _ in prepared_params]
    flops = 2 * batch * sum(dims[i] * dims[i + 1] for i in range(len(dims) - 1))
    bytes_accessed = (
        batch * in_dim * x.dtype.itemsize
        + batch * out_pad * jnp.dtype(out_dtype).itemsize
        + sum(w.size * w.dtype.itemsize + b.size * b.dtype.itemsize
              for w, b in prepared_params))
    cost = pl.CostEstimate(flops=int(flops), transcendentals=0,
                           bytes_accessed=int(bytes_accessed))

    # --- VMEM hygiene: raise the scoped limit only for big tile sweeps. ---
    vmem_est = (
        2 * tile_b * in_dim * 4                    # double-buffered f32 x tile
        + 2 * tile_b * out_pad * 4                 # double-buffered out tile
        + 2 * sum(w.size * 2 + b.size * 4 for w, b in prepared_params)
        + tile_b * (256 + 128 + 64 + 32) * 4)      # spilled f32 intermediates
    compiler_kwargs = dict(dimension_semantics=("parallel",))
    if vmem_est > 12 * 1024 * 1024:
        # v5e default scoped VMEM is 16 MiB; keep well under v7x's 64 MiB phys.
        compiler_kwargs["vmem_limit_bytes"] = min(
            56 * 1024 * 1024, _round_up(2 * vmem_est, 1 << 20))

    out = pl.pallas_call(
        mlp_kernel,
        out_shape=jax.ShapeDtypeStruct((batch, out_pad), out_dtype),
        grid=(n_tiles,),
        in_specs=in_specs,
        out_specs=out_spec,
        compiler_params=pltpu.CompilerParams(**compiler_kwargs),
        cost_estimate=cost,
    )(*flat_args)

    # Callers that can consume the padded slab should skip this slice.
    return out[:, :out_dim]


def init_linear_params(key, in_dim, out_dim):
    """Deterministic init mimicking nn.Linear (uniform +/- 1/sqrt(fan_in))."""
    kw, kb = jax.random.split(key)
    bound = 1.0 / jnp.sqrt(jnp.float32(in_dim))
    # Stored as (in, out): transpose of PyTorch's (out, in) layout.
    w = jax.random.uniform(kw, (in_dim, out_dim), jnp.float32, -bound, bound)
    b = jax.random.uniform(kb, (1, out_dim), jnp.float32, -bound, bound)
    return w, b


def reference_forward(x, params):
    """bf16-matmul / f32-accumulate reference matching the kernel's numerics."""
    h = x.astype(jnp.bfloat16)
    n = len(params)
    for i, (w, b) in enumerate(params):
        h = jnp.dot(h, w.astype(jnp.bfloat16),
                    preferred_element_type=jnp.float32) + b
        if i < n - 1:
            h = jnp.maximum(h, 0.0).astype(jnp.bfloat16)
    return h


if __name__ == "__main__":
    # Small shapes consistent with the module: X_train flattened to
    # (batch, input_dim); y_train is (batch, output_dim).
    batch = 8
    input_dim = 64
    output_dim = 4
    layer_dims = [input_dim, 256, 128, 64, 32, output_dim]

    key = jax.random.PRNGKey(0)
    key, kx = jax.random.split(key)
    x = jax.random.normal(kx, (batch, input_dim), dtype=jnp.float32)

    params = []
    for i in range(len(layer_dims) - 1):
        key, kl = jax.random.split(key)
        params.append(init_linear_params(kl, layer_dims[i], layer_dims[i + 1]))

    # One-time weight prep (pad + cast), done outside the per-call wrapper.
    prepared, out_dim = prepare_params(params)

    fwd = jax.jit(functools.partial(fully_connected_network,
                                    prepared_params=prepared, out_dim=out_dim))

    out = jax.block_until_ready(fwd(x))
    ref = reference_forward(x, params)
    assert out.shape == (batch, output_dim)
    assert jnp.allclose(out, ref, atol=1e-2, rtol=1e-2), "mismatch vs reference"

    # Exercise the padding-free ragged-grid path (batch not a multiple of tile_b).
    batch2 = 100
    key, kx2 = jax.random.split(key)
    x2 = jax.random.normal(kx2, (batch2, input_dim), dtype=jnp.float32)
    out2 = jax.block_until_ready(fwd(x2))
    ref2 = reference_forward(x2, params)
    assert out2.shape == (batch2, output_dim)
    assert jnp.allclose(out2, ref2, atol=1e-2, rtol=1e-2), "mismatch (ragged batch)"

    print("KERNEL_OK")
</pallas_src>

<mosaic_0001>
module attributes {stable_mosaic.version = 11 : i64} {
  func.func @mlp_kernel(%arg0: i32, %arg1: memref<8x64xf32, #tpu.memory_space<vmem>>, %arg2: memref<64x256xbf16, #tpu.memory_space<vmem>>, %arg3: memref<1x256xf32, #tpu.memory_space<vmem>>, %arg4: memref<256x128xbf16, #tpu.memory_space<vmem>>, %arg5: memref<1x128xf32, #tpu.memory_space<vmem>>, %arg6: memref<128x64xbf16, #tpu.memory_space<vmem>>, %arg7: memref<1x64xf32, #tpu.memory_space<vmem>>, %arg8: memref<64x32xbf16, #tpu.memory_space<vmem>>, %arg9: memref<1x32xf32, #tpu.memory_space<vmem>>, %arg10: memref<32x128xbf16, #tpu.memory_space<vmem>>, %arg11: memref<1x128xf32, #tpu.memory_space<vmem>>, %arg12: memref<8x128xf32, #tpu.memory_space<vmem>>) attributes {dimension_semantics = [#tpu.dimension_semantics<parallel>], iteration_bounds = array<i64: 1>, scalar_prefetch = 0 : i64, scratch_operands = 0 : i64, tpu.core_type = #tpu.core_type<tc>, window_params = [{transform_indices = @transform_0, window_bounds = array<i64: 8, 64>}, {pipeline_mode = #tpu.pipeline_mode<synchronous>, transform_indices = @transform_1, window_bounds = array<i64: 64, 256>}, {pipeline_mode = #tpu.pipeline_mode<synchronous>, transform_indices = @transform_2, window_bounds = array<i64: 1, 256>}, {pipeline_mode = #tpu.pipeline_mode<synchronous>, transform_indices = @transform_3, window_bounds = array<i64: 256, 128>}, {pipeline_mode = #tpu.pipeline_mode<synchronous>, transform_indices = @transform_4, window_bounds = array<i64: 1, 128>}, {pipeline_mode = #tpu.pipeline_mode<synchronous>, transform_indices = @transform_5, window_bounds = array<i64: 128, 64>}, {pipeline_mode = #tpu.pipeline_mode<synchronous>, transform_indices = @transform_6, window_bounds = array<i64: 1, 64>}, {pipeline_mode = #tpu.pipeline_mode<synchronous>, transform_indices = @transform_7, window_bounds = array<i64: 64, 32>}, {pipeline_mode = #tpu.pipeline_mode<synchronous>, transform_indices = @transform_8, window_bounds = array<i64: 1, 32>}, {pipeline_mode = #tpu.pipeline_mode<synchronous>, transform_indices = @transform_9, window_bounds = array<i64: 32, 128>}, {pipeline_mode = #tpu.pipeline_mode<synchronous>, transform_indices = @transform_10, window_bounds = array<i64: 1, 128>}, {transform_indices = @transform_11, window_bounds = array<i64: 8, 128>}]} {
    %c0 = arith.constant 0 : index
    %c0_0 = arith.constant 0 : index
    %0 = vector.load %arg1[%c0, %c0_0] : memref<8x64xf32, #tpu.memory_space<vmem>>, vector<8x64xf32>
    %1 = arith.truncf %0 : vector<8x64xf32> to vector<8x64xbf16>
    %c0_1 = arith.constant 0 : index
    %c0_2 = arith.constant 0 : index
    %2 = vector.load %arg2[%c0_1, %c0_2] : memref<64x256xbf16, #tpu.memory_space<vmem>>, vector<64x256xbf16>
    %cst = arith.constant dense<0.000000e+00> : vector<8x256xf32>
    %3 = tpu.matmul %1, %2, %cst {dimension_numbers = #tpu.dot_dimension_numbers<[1], [0], [0], [1], [0, 0, 1, 1], [], []>} : vector<8x64xbf16>, vector<64x256xbf16>, vector<8x256xf32> -> vector<8x256xf32>
    %c0_3 = arith.constant 0 : index
    %c0_4 = arith.constant 0 : index
    %4 = vector.load %arg3[%c0_3, %c0_4] : memref<1x256xf32, #tpu.memory_space<vmem>>, vector<1x256xf32>
    %5 = vector.broadcast %4 : vector<1x256xf32> to vector<8x256xf32>
    %6 = arith.addf %3, %5 : vector<8x256xf32>
    %cst_5 = arith.constant 0.000000e+00 : f32
    %7 = vector.broadcast %cst_5 : f32 to vector<8x256xf32>
    %8 = arith.maximumf %6, %7 : vector<8x256xf32>
    %9 = arith.truncf %8 : vector<8x256xf32> to vector<8x256xbf16>
    %c0_6 = arith.constant 0 : index
    %c0_7 = arith.constant 0 : index
    %10 = vector.load %arg4[%c0_6, %c0_7] : memref<256x128xbf16, #tpu.memory_space<vmem>>, vector<256x128xbf16>
    %cst_8 = arith.constant dense<0.000000e+00> : vector<8x128xf32>
    %11 = tpu.matmul %9, %10, %cst_8 {dimension_numbers = #tpu.dot_dimension_numbers<[1], [0], [0], [1], [0, 0, 1, 1], [], []>} : vector<8x256xbf16>, vector<256x128xbf16>, vector<8x128xf32> -> vector<8x128xf32>
    %c0_9 = arith.constant 0 : index
    %c0_10 = arith.constant 0 : index
    %12 = vector.load %arg5[%c0_9, %c0_10] : memref<1x128xf32, #tpu.memory_space<vmem>>, vector<1x128xf32>
    %13 = vector.broadcast %12 : vector<1x128xf32> to vector<8x128xf32>
    %14 = arith.addf %11, %13 : vector<8x128xf32>
    %cst_11 = arith.constant 0.000000e+00 : f32
    %15 = vector.broadcast %cst_11 : f32 to vector<8x128xf32>
    %16 = arith.maximumf %14, %15 : vector<8x128xf32>
    %17 = arith.truncf %16 : vector<8x128xf32> to vector<8x128xbf16>
    %c0_12 = arith.constant 0 : index
    %c0_13 = arith.constant 0 : index
    %18 = vector.load %arg6[%c0_12, %c0_13] : memref<128x64xbf16, #tpu.memory_space<vmem>>, vector<128x64xbf16>
    %cst_14 = arith.constant dense<0.000000e+00> : vector<8x64xf32>
    %19 = tpu.matmul %17, %18, %cst_14 {dimension_numbers = #tpu.dot_dimension_numbers<[1], [0], [0], [1], [0, 0, 1, 1], [], []>} : vector<8x128xbf16>, vector<128x64xbf16>, vector<8x64xf32> -> vector<8x64xf32>
    %c0_15 = arith.constant 0 : index
    %c0_16 = arith.constant 0 : index
    %20 = vector.load %arg7[%c0_15, %c0_16] : memref<1x64xf32, #tpu.memory_space<vmem>>, vector<1x64xf32>
    %21 = vector.broadcast %20 : vector<1x64xf32> to vector<8x64xf32>
    %22 = arith.addf %19, %21 : vector<8x64xf32>
    %cst_17 = arith.constant 0.000000e+00 : f32
    %23 = vector.broadcast %cst_17 : f32 to vector<8x64xf32>
    %24 = arith.maximumf %22, %23 : vector<8x64xf32>
    %25 = arith.truncf %24 : vector<8x64xf32> to vector<8x64xbf16>
    %c0_18 = arith.constant 0 : index
    %c0_19 = arith.constant 0 : index
    %26 = vector.load %arg8[%c0_18, %c0_19] : memref<64x32xbf16, #tpu.memory_space<vmem>>, vector<64x32xbf16>
    %cst_20 = arith.constant dense<0.000000e+00> : vector<8x32xf32>
    %27 = tpu.matmul %25, %26, %cst_20 {dimension_numbers = #tpu.dot_dimension_numbers<[1], [0], [0], [1], [0, 0, 1, 1], [], []>} : vector<8x64xbf16>, vector<64x32xbf16>, vector<8x32xf32> -> vector<8x32xf32>
    %c0_21 = arith.constant 0 : index
    %c0_22 = arith.constant 0 : index
    %28 = vector.load %arg9[%c0_21, %c0_22] : memref<1x32xf32, #tpu.memory_space<vmem>>, vector<1x32xf32>
    %29 = vector.broadcast %28 : vector<1x32xf32> to vector<8x32xf32>
    %30 = arith.addf %27, %29 : vector<8x32xf32>
    %cst_23 = arith.constant 0.000000e+00 : f32
    %31 = vector.broadcast %cst_23 : f32 to vector<8x32xf32>
    %32 = arith.maximumf %30, %31 : vector<8x32xf32>
    %33 = arith.truncf %32 : vector<8x32xf32> to vector<8x32xbf16>
    %c0_24 = arith.constant 0 : index
    %c0_25 = arith.constant 0 : index
    %34 = vector.load %arg10[%c0_24, %c0_25] : memref<32x128xbf16, #tpu.memory_space<vmem>>, vector<32x128xbf16>
    %cst_26 = arith.constant dense<0.000000e+00> : vector<8x128xf32>
    %35 = tpu.matmul %33, %34, %cst_26 {dimension_numbers = #tpu.dot_dimension_numbers<[1], [0], [0], [1], [0, 0, 1, 1], [], []>} : vector<8x32xbf16>, vector<32x128xbf16>, vector<8x128xf32> -> vector<8x128xf32>
    %c0_27 = arith.constant 0 : index
    %c0_28 = arith.constant 0 : index
    %36 = vector.load %arg11[%c0_27, %c0_28] : memref<1x128xf32, #tpu.memory_space<vmem>>, vector<1x128xf32>
    %37 = vector.broadcast %36 : vector<1x128xf32> to vector<8x128xf32>
    %38 = arith.addf %35, %37 : vector<8x128xf32>
    %c0_29 = arith.constant 0 : index
    %c0_30 = arith.constant 0 : index
    %39 = vector.load %arg12[%c0_29, %c0_30] : memref<8x128xf32, #tpu.memory_space<vmem>>, vector<8x128xf32>
    tpu.vector_store %arg12[%c0_29, %c0_30], %38 {strides = array<i32>} : memref<8x128xf32, #tpu.memory_space<vmem>>, vector<8x128xf32>,
    return
  }
  func.func @transform_0(%arg0: i32) -> (i32, i32) {
    %c0_i32 = arith.constant 0 : i32
    %c0_i32_0 = arith.constant 0 : i32
    return %arg0, %c0_i32 : i32, i32
  }
  func.func @transform_1(%arg0: i32) -> (i32, i32) {
    %c0_i32 = arith.constant 0 : i32
    %c0_i32_0 = arith.constant 0 : i32
    %c0_i32_1 = arith.constant 0 : i32
    return %c0_i32, %c0_i32_0 : i32, i32
  }
  func.func @transform_2(%arg0: i32) -> (i32, i32) {
    %c0_i32 = arith.constant 0 : i32
    %c0_i32_0 = arith.constant 0 : i32
    %c0_i32_1 = arith.constant 0 : i32
    return %c0_i32, %c0_i32_0 : i32, i32
  }
  func.func @transform_3(%arg0: i32) -> (i32, i32) {
    %c0_i32 = arith.constant 0 : i32
    %c0_i32_0 = arith.constant 0 : i32
    %c0_i32_1 = arith.constant 0 : i32
    return %c0_i32, %c0_i32_0 : i32, i32
  }
  func.func @transform_4(%arg0: i32) -> (i32, i32) {
    %c0_i32 = arith.constant 0 : i32
    %c0_i32_0 = arith.constant 0 : i32
    %c0_i32_1 = arith.constant 0 : i32
    return %c0_i32, %c0_i32_0 : i32, i32
  }
  func.func @transform_5(%arg0: i32) -> (i32, i32) {
    %c0_i32 = arith.constant 0 : i32
    %c0_i32_0 = arith.constant 0 : i32
    %c0_i32_1 = arith.constant 0 : i32
    return %c0_i32, %c0_i32_0 : i32, i32
  }
  func.func @transform_6(%arg0: i32) -> (i32, i32) {
    %c0_i32 = arith.constant 0 : i32
    %c0_i32_0 = arith.constant 0 : i32
    %c0_i32_1 = arith.constant 0 : i32
    return %c0_i32, %c0_i32_0 : i32, i32
  }
  func.func @transform_7(%arg0: i32) -> (i32, i32) {
    %c0_i32 = arith.constant 0 : i32
    %c0_i32_0 = arith.constant 0 : i32
    %c0_i32_1 = arith.constant 0 : i32
    return %c0_i32, %c0_i32_0 : i32, i32
  }
  func.func @transform_8(%arg0: i32) -> (i32, i32) {
    %c0_i32 = arith.constant 0 : i32
    %c0_i32_0 = arith.constant 0 : i32
    %c0_i32_1 = arith.constant 0 : i32
    return %c0_i32, %c0_i32_0 : i32, i32
  }
  func.func @transform_9(%arg0: i32) -> (i32, i32) {
    %c0_i32 = arith.constant 0 : i32
    %c0_i32_0 = arith.constant 0 : i32
    %c0_i32_1 = arith.constant 0 : i32
    return %c0_i32, %c0_i32_0 : i32, i32
  }
  func.func @transform_10(%arg0: i32) -> (i32, i32) {
    %c0_i32 = arith.constant 0 : i32
    %c0_i32_0 = arith.constant 0 : i32
    %c0_i32_1 = arith.constant 0 : i32
    return %c0_i32, %c0_i32_0 : i32, i32
  }
  func.func @transform_11(%arg0: i32) -> (i32, i32) {
    %c0_i32 = arith.constant 0 : i32
    %c0_i32_0 = arith.constant 0 : i32
    return %arg0, %c0_i32 : i32, i32
  }
}

</mosaic_0001>

<bundles_post_ra>
// kernel: fully_connected_network.1
= control target key start
LH: loop header
LB: loop body
LE: loop exit
PB: predicated region body
PF: predicated region fallthrough
CT: control target
= control target key end

     0   :  { %16 = vsyncpa [#allocation3], 0  ;;  %s1257_s0 = inlined_call_operand.hbm [shape: f32[8,64], index: 0, kind: input, shape index: {}]   ;;  %s1258_s1 = inlined_call_operand.vmem [shape: bf16[64,256], index: 1, kind: input, shape index: {}]   ;;  %s1259_s2 = inlined_call_operand.hbm [shape: f32[1,256], index: 2, kind: input, shape index: {}]   ;;  %s1260_s3 = inlined_call_operand.vmem [shape: bf16[256,128], index: 3, kind: input, shape index: {}]   ;;  %s1261_s4 = inlined_call_operand.hbm [shape: f32[1,128], index: 4, kind: input, shape index: {}]   ;;  %s1262_s5 = inlined_call_operand.hbm [shape: bf16[128,64], index: 5, kind: input, shape index: {}]   ;;  %s1263_s6 = inlined_call_operand.hbm [shape: f32[1,64], index: 6, kind: input, shape index: {}]   ;;  %s1264_s7 = inlined_call_operand.vmem [shape: bf16[64,32], index: 7, kind: input, shape index: {}]   ;;  %s1265_s8 = inlined_call_operand.hbm [shape: f32[1,32], index: 8, kind: input, shape index: {}]   ;;  %s1266_s9 = inlined_call_operand.vmem [shape: bf16[32,128], index: 9, kind: input, shape index: {}]   ;;  %s1267_s10 = inlined_call_operand.vmem [shape: f32[1,128], index: 10, kind: input, shape index: {}]   ;;  %s1268_s11 = inlined_call_operand.vmem [shape: f32[8,128], index: 11, kind: output, shape index: {}]  }
   0x1   :  { %17 = vsyncpa [#allocation5], 0 }
   0x2   :  { %18 = vsyncpa [#allocation8], 0 }
   0x3   :  { %19 = vsyncpa [#allocation11], 0  ;;  %s989_s17 = smov [#allocation4]   ;;  %s990_s19 = smov [#allocation7]  }
   0x4   :  { %s38_s18 = sshll.u32 %s989_s17, 4  ;;  %s59_s20 = sshll.u32 %s990_s19, 4  ;;  %s39_s18 = int_to_ptr.vmem [resolvable:$true] %s38_s18  ;;  %s1060_s20 = int_to_ptr.vmem [resolvable:$true] %s59_s20 }
   0x5   :  { %s849_s23 = scalar_lea.hbm %s1259_s2, 32 }
   0x6   :  { %p850_p0 = scmp.ne.s32.totalorder %s1259_s2, %s849_s23  ;;  %p853_p1 = scmp.lt.u32.totalorder %s849_s23, %s1259_s2 }
   0x8   :  { %p855_p2 = pnand %p853_p1, %p850_p0 }
   0xa   :  { %858 = shalt.err (!%p855_p2)
}
   0xb   :  { %s859_s28 = scalar_lea.vmem %s39_s18, 32  ;;  %p864_p4 = scmp.lt.s32.totalorder %s39_s18, %s39_s18 }
   0xc   :  { %p860_p3 = scmp.ne.s32.totalorder %s39_s18, %s859_s28  ;;  %p865_p5 = scmp.lt.s32.totalorder %s859_s28, %s859_s28 }
   0xe   :  { %p866_p6 = por %p865_p5, %p864_p4 }
  0x10   :  { %p867_p7 = pnand %p866_p6, %p860_p3 }
  0x12   :  { %870 = shalt.err (!%p867_p7)
}
  0x13   :  { %41 = dma.hbm_to_vmem [thread:$0]  %s1259_s2, 32, %s39_s18, [#allocation5]  }
  0x14   :  { %s871_s14 = scalar_lea.hbm %s1262_s5, 1024 }
  0x15   :  { %p872_p8 = scmp.ne.s32.totalorder %s1262_s5, %s871_s14  ;;  %p875_p9 = scmp.lt.u32.totalorder %s871_s14, %s1262_s5 }
  0x17   :  { %p877_p10 = pnand %p875_p9, %p872_p8 }
  0x19   :  { %880 = shalt.err (!%p877_p10)
}
  0x1a   :  { %s881_s21 = scalar_lea.vmem %s1060_s20, 1024  ;;  %p886_p12 = scmp.lt.s32.totalorder %s1060_s20, %s1060_s20 }
  0x1b   :  { %p882_p11 = scmp.ne.s32.totalorder %s1060_s20, %s881_s21  ;;  %p887_p13 = scmp.lt.s32.totalorder %s881_s21, %s881_s21 }
  0x1d   :  { %p888_p0 = por %p887_p13, %p886_p12 }
  0x1f   :  { %p889_p1 = pnand %p888_p0, %p882_p11 }
  0x21   :  { %892 = shalt.err (!%p889_p1)
}
  0x22   :  { %s991_s2 = smov 64   ;;  %s992_s18 = smov 4  }
  0x23   :  { %65 = dma.hbm_to_vmem [thread:$0]  %s1262_s5, 1024, %s1060_s20, [#allocation8], %s991_s2, %s991_s2, %s992_s18  }
  0x24   :  { %s993_s24 = smov [#allocation2]   ;;  %s994_s26 = smov [#allocation6]  }
  0x25   :  { %s26_s25 = sshll.u32 %s993_s24, 4  ;;  %s50_s27 = sshll.u32 %s994_s26, 4  ;;  %s27_s25 = int_to_ptr.vmem [resolvable:$true] %s26_s25  ;;  %s51_s27 = int_to_ptr.vmem [resolvable:$true] %s50_s27 }
  0x26   :  { %s893_s30 = scalar_lea.hbm %s1257_s0, 128 }
  0x27   :  { %p894_p2 = scmp.ne.s32.totalorder %s1257_s0, %s893_s30  ;;  %p897_p3 = scmp.lt.u32.totalorder %s893_s30, %s1257_s0 }
  0x29   :  { %p899_p4 = pnand %p897_p3, %p894_p2 }
  0x2b   :  { %902 = shalt.err (!%p899_p4)
}
  0x2c   :  { %s903_s5 = scalar_lea.vmem %s27_s25, 128  ;;  %p908_p6 = scmp.lt.s32.totalorder %s27_s25, %s27_s25 }
  0x2d   :  { %p904_p5 = scmp.ne.s32.totalorder %s27_s25, %s903_s5  ;;  %p909_p7 = scmp.lt.s32.totalorder %s903_s5, %s903_s5 }
  0x2f   :  { %p910_p8 = por %p909_p7, %p908_p6 }
  0x31   :  { %p911_p9 = pnand %p910_p8, %p904_p5 }
  0x33   :  { %914 = shalt.err (!%p911_p9)
}
  0x34   :  { %29 = dma.hbm_to_vmem [thread:$0]  %s1257_s0, 128, %s27_s25, [#allocation3]  }
  0x35   :  { %s915_s21 = scalar_lea.hbm %s1261_s4, 16 }
  0x36   :  { %p916_p10 = scmp.ne.s32.totalorder %s1261_s4, %s915_s21  ;;  %p919_p11 = scmp.lt.u32.totalorder %s915_s21, %s1261_s4 }
  0x38   :  { %p921_p12 = pnand %p919_p11, %p916_p10 }
  0x3a   :  { %924 = shalt.err (!%p921_p12)
}
  0x3b   :  { %s925_s24 = scalar_lea.vmem %s51_s27, 16  ;;  %s929_s26 = scalar_lea.vmem %s51_s27, 32 }
  0x3c   :  { %p926_p13 = scmp.ne.s32.totalorder %s51_s27, %s925_s24  ;;  %p930_p0 = scmp.lt.s32.totalorder %s51_s27, %s51_s27 }
  0x3d   :  { %p931_p1 = scmp.lt.s32.totalorder %s929_s26, %s925_s24 }
  0x3f   :  { %p932_p2 = por %p931_p1, %p930_p0 }
  0x41   :  { %p933_p3 = pnand %p932_p2, %p926_p13 }
  0x43   :  { %936 = shalt.err (!%p933_p3)
}
  0x44   :  { %53 = dma.hbm_to_vmem [thread:$0]  %s1261_s4, 16, %s51_s27, [#allocation5]  }
  0x45   :  { %s995_s28 = smov [#allocation9]   ;;  %s996_s30 = smov [#allocation10]  }
  0x46   :  { %s72_s29 = sshll.u32 %s995_s28, 4  ;;  %s84_s12 = sshll.u32 %s996_s30, 4  ;;  %s73_s29 = int_to_ptr.vmem [resolvable:$true] %s72_s29  ;;  %s85_s12 = int_to_ptr.vmem [resolvable:$true] %s84_s12 }
  0x47   :  { %s937_s15 = scalar_lea.hbm %s1263_s6, 16 }
  0x48   :  { %p938_p4 = scmp.ne.s32.totalorder %s1263_s6, %s937_s15  ;;  %p941_p5 = scmp.lt.u32.totalorder %s937_s15, %s1263_s6 }
  0x4a   :  { %p943_p6 = pnand %p941_p5, %p938_p4 }
  0x4c   :  { %946 = shalt.err (!%p943_p6)
}
  0x4d   :  { %s947_s4 = scalar_lea.vmem %s73_s29, 16  ;;  %s951_s27 = scalar_lea.vmem %s73_s29, 32 }
  0x4e   :  { %p948_p7 = scmp.ne.s32.totalorder %s73_s29, %s947_s4  ;;  %p952_p8 = scmp.lt.s32.totalorder %s73_s29, %s73_s29 }
  0x4f   :  { %p953_p9 = scmp.lt.s32.totalorder %s951_s27, %s947_s4 }
  0x51   :  { %p954_p10 = por %p953_p9, %p952_p8 }
  0x53   :  { %p955_p11 = pnand %p954_p10, %p948_p7 }
  0x55   :  { %958 = shalt.err (!%p955_p11)
}
  0x56   :  { %75 = dma.hbm_to_vmem [thread:$0]  %s1263_s6, 16, %s73_s29, [#allocation8]  }
  0x57   :  { %s959_s22 = scalar_lea.hbm %s1265_s8, 16 }
  0x58   :  { %p960_p12 = scmp.ne.s32.totalorder %s1265_s8, %s959_s22  ;;  %p963_p13 = scmp.lt.u32.totalorder %s959_s22, %s1265_s8 }
  0x5a   :  { %p965_p0 = pnand %p963_p13, %p960_p12 }
  0x5c   :  { %968 = shalt.err (!%p965_p0)
}
  0x5d   :  { %s969_s25 = scalar_lea.vmem %s85_s12, 16  ;;  %s973_s28 = scalar_lea.vmem %s85_s12, 32 }
  0x5e   :  { %p970_p1 = scmp.ne.s32.totalorder %s85_s12, %s969_s25  ;;  %p974_p2 = scmp.lt.s32.totalorder %s85_s12, %s85_s12 }
  0x5f   :  { %p975_p3 = scmp.lt.s32.totalorder %s973_s28, %s969_s25 }
  0x61   :  { %p976_p4 = por %p975_p3, %p974_p2 }
  0x63   :  { %p977_p5 = pnand %p976_p4, %p970_p1 }
  0x65   :  { %980 = shalt.err (!%p977_p5)
}
  0x66   :  { %87 = dma.hbm_to_vmem [thread:$0]  %s1265_s8, 16, %s85_s12, [#allocation11]  }
  0x67   :  { %981 = dma.done.wait [#allocation3], 128  }
  0x68   :  { %982 = vsyncadd [#allocation3], 4294967168 }
  0x69   :  { %983 = dma.done.wait [#allocation5], 48  }
  0x6a   :  { %984 = vsyncadd [#allocation5], 4294967248 }
  0x6b   :  { %985 = dma.done.wait [#allocation8], 1040  }
  0x6c   :  { %986 = vsyncadd [#allocation8], 4294966256 }
  0x6d   :  { %987 = dma.done.wait [#allocation11], 16  }
  0x6e   :  { %988 = vsyncadd [#allocation11], 4294967280  ;;  %v997_v0 = vmov 0   ;;  %v807_v1 = vld [vmem:[%s1258_s1 + $0x4] ss:$8 sps:$4 sm:$0xff]   ;;  %v823_v13 = vld [vmem:[%s1260_s3 + $0x50] sm:$0xff]   ;;  %v123_v34 = vlaneseq }
  0x6f   :  { %209 = vmatprep.mubr.bf16.mxu0 %v997_v0  ;;  %v809_v2 = vld [vmem:[%s1258_s1] ss:$8 sps:$4 sm:$0xff]   ;;  %177 = vmatprep.subr.bf16.mxu0 %v807_v1  ;;  %v810_v3 = vld [vmem:[%s1258_s1 + $0x14] ss:$8 sps:$4 sm:$0xff]   ;;  %v812_v4 = vld [vmem:[%s1258_s1 + $0x10] ss:$8 sps:$4 sm:$0xff]  }
  0x70   :  { %178 = vmatpush1.bf16.msra.mxu0 %v809_v2  ;;  %v813_v5 = vld [vmem:[%s1258_s1 + $0x24] ss:$8 sps:$4 sm:$0xff]   ;;  %v815_v6 = vld [vmem:[%s1258_s1 + $0x20] ss:$8 sps:$4 sm:$0xff]   ;;  %v816_v7 = vld [vmem:[%s1258_s1 + $0x34] ss:$8 sps:$4 sm:$0xff]  }
  0x71   :  { %179 = vmatprep.subr.bf16.mxu0 %v810_v3  ;;  %v819_v8 = vld [vmem:[%s1260_s3 + $0x40] sm:$0xff]   ;;  %v821_v10 = vld [vmem:[%s1260_s3 + $0x48] sm:$0xff]   ;;  %v818_v11 = vld [vmem:[%s1258_s1 + $0x30] ss:$8 sps:$4 sm:$0xff]   ;;  %vm173_vm0 = vcmask 523264   ;;  %v998_v28 = vmov 0.0  }
  0x72   :  { %v820_v9 = vld [vmem:[%s1260_s3] sm:$0xff]   ;;  %717 = vmatprep.subr.bf16.mxu1 %v819_v8  ;;  %v822_v12 = vld [vmem:[%s1260_s3 + $0x8] sm:$0xff]   ;;  %v824_v15 = vld [vmem:[%s1260_s3 + $0x10] sm:$0xff]   ;;  %v124_v35 = vshrl.u32 %v123_v34, 7  ;;  %vm999_vm1 = vmmov 0   ;;  %vm619_vm2 = vcmask 261120  }
  0x73   :  { %718 = vmatpush3.bf16.msra.mxu1 %v820_v9  ;;  %v111_v14 = vld [vmem:[#allocation2] sm:$0xff]  ;;  %v825_v17 = vld [vmem:[%s1260_s3 + $0x58] sm:$0xff]   ;;  %v829_v21 = vld [vmem:[%s1260_s3 + $0x68] sm:$0xff]  }
  0x74   :  { %180 = vmatpush1.bf16.msra.mxu0 %v812_v4  ;;  %719 = vmatprep.subr.bf16.mxu1 %v821_v10  ;;  %v112_v16 = vpack.c.bf16 %v111_v14, %v111_v14  ;;  %v826_v18 = vld [vmem:[%s1260_s3 + $0x18] sm:$0xff]   ;;  %v827_v19 = vld [vmem:[%s1260_s3 + $0x60] sm:$0xff]   ;;  %v830_v22 = vld [vmem:[%s1260_s3 + $0x28] sm:$0xff]   ;;  %v125_v36 = vsub.s32 0, %v124_v35  ;;  %v129_v38 = vsub.s32 1, %v124_v35 }
  0x75   :  { %181 = vmatprep.subr.bf16.mxu0 %v813_v5  ;;  %v828_v20 = vld [vmem:[%s1260_s3 + $0x20] sm:$0xff]   ;;  %v831_v23 = vld [vmem:[%s1260_s3 + $0x70] sm:$0xff]   ;;  %v833_v25 = vld [vmem:[%s1260_s3 + $0x78] sm:$0xff]  }
  0x76   :  { %v832_v24 = vld [vmem:[%s1260_s3 + $0x30] sm:$0xff]   ;;  %v834_v26 = vld [vmem:[%s1260_s3 + $0x38] sm:$0xff]   ;;  %v838_v31 = vld [vmem:[#allocation7 + $0x18] sm:$0xff]  }
  0x77   :  { %720 = vmatpush3.bf16.msra.mxu1 %v822_v12  ;;  %v835_v27 = vld [vmem:[#allocation7] sm:$0xff]   ;;  %v836_v29 = vld [vmem:[#allocation7 + $0x8] sm:$0xff]   ;;  %v837_v30 = vld [vmem:[#allocation7 + $0x10] sm:$0xff]  }
  0x78   :  { %182 = vmatpush1.bf16.msra.mxu0 %v815_v6  ;;  %721 = vmatprep.subr.bf16.mxu1 %v823_v13  ;;  %v839_v32 = vld [vmem:[#allocation7 + $0x20] sm:$0xff]   ;;  %v840_v33 = vld [vmem:[#allocation7 + $0x28] sm:$0xff]   ;;  %v121_v37 = vld [vmem:[#allocation4] sm:$0x3] }
  0x79   :  { %183 = vmatprep.subr.bf16.mxu0 %v816_v7  ;;  %v126_v39 = vrot.slane %v121_v37, %v125_v36  ;;  %v130_v40 = vrot.slane %v121_v37, %v129_v38  ;;  %v841_v51 = vld [vmem:[#allocation7 + $0x30] sm:$0xff]   ;;  %v842_v52 = vld [vmem:[#allocation7 + $0x38] sm:$0xff]   ;;  %v845_v0 = vld [vmem:[%s1264_s7 + $0x10] sm:$0xff]  }
  0x7a   :  { %v843_v53 = vld [vmem:[%s1264_s7] sm:$0xff]   ;;  %v844_v54 = vld [vmem:[%s1264_s7 + $0x8] sm:$0xff]   ;;  %v846_v1 = vld [vmem:[%s1264_s7 + $0x18] sm:$0xff]  }
  0x7b   :  { %722 = vmatpush3.bf16.msra.mxu1 %v824_v15  ;;  %v681_v56 = vld [vmem:[#allocation6] ss:$0 sm:$0xff]  ;;  %v847_v2 = vld [vmem:[%s1266_s9] sm:$0xff]   ;;  %v698_v3 = vld [vmem:[#allocation9] ss:$0 sm:$0xff] }
  0x7c   :  { %184 = vmatpush1.bf16.msra.mxu0 %v818_v11  ;;  %723 = vmatprep.subr.bf16.mxu1 %v825_v17  ;;  %v848_v11 = vld [vmem:[%s1266_s9 + $0x8] sm:$0xff]  }
  0x7d   :  { %756 = vmatprep.subr.bf16.mxu0 %v998_v28  ;;  %v707_v12 = vld [vmem:[#allocation10] ss:$0 sm:$0xff] }
  0x7f   :  { %680 = vmatmul.mubr.msk.bf16.vlgmr.msra.gmra.mrb[0].mxu0 %vm173_vm0, %v112_v16  ;;  %724 = vmatpush3.bf16.msra.mxu1 %v826_v18 }
  0x80   :  { %725 = vmatprep.subr.bf16.mxu1 %v827_v19  ;;  %757 = vmatpush3.bf16.msra.mxu0 %v835_v27 }
  0x81   :  { %758 = vmatprep.subr.bf16.mxu0 %v998_v28  ;;  %772 = vmatprep.mubr.msk.bf16.mxu0 %vm999_vm1, %v998_v28 }
  0x83   :  { %726 = vmatpush3.bf16.msra.mxu1 %v828_v20  ;;  %v713_v20 = vld [vmem:[%s1267_s10] ss:$0 sm:$0xff] }
  0x84   :  { %727 = vmatprep.subr.bf16.mxu1 %v829_v21  ;;  %759 = vmatpush3.bf16.msra.mxu0 %v836_v29 }
  0x85   :  { %760 = vmatprep.subr.bf16.mxu0 %v998_v28 }
  0x87   :  { %728 = vmatpush3.bf16.msra.mxu1 %v830_v22 }
  0x88   :  { %729 = vmatprep.subr.bf16.mxu1 %v831_v23  ;;  %761 = vmatpush3.bf16.msra.mxu0 %v837_v30 }
  0x89   :  { %762 = vmatprep.subr.bf16.mxu0 %v998_v28 }
  0x8b   :  { %730 = vmatpush3.bf16.msra.mxu1 %v832_v24 }
  0x8c   :  { %731 = vmatprep.subr.bf16.mxu1 %v833_v25  ;;  %763 = vmatpush3.bf16.msra.mxu0 %v838_v31 }
  0x8d   :  { %764 = vmatprep.subr.bf16.mxu0 %v998_v28 }
  0x8f   :  { %732 = vmatpush3.bf16.msra.mxu1 %v834_v26 }
  0x90   :  { %776 = vmatprep.subr.bf16.mxu1 %v998_v28  ;;  %765 = vmatpush3.bf16.msra.mxu0 %v839_v32 }
  0x91   :  { %766 = vmatprep.subr.bf16.mxu0 %v998_v28 }
  0x94   :  { %767 = vmatpush3.bf16.msra.mxu0 %v840_v33 }
  0x95   :  { %768 = vmatprep.subr.bf16.mxu0 %v998_v28 }
  0x98   :  { %769 = vmatpush3.bf16.msra.mxu0 %v841_v51 }
  0x99   :  { %770 = vmatprep.subr.bf16.mxu0 %v998_v28 }
  0x9c   :  { %771 = vmatpush3.bf16.msra.mxu0 %v842_v52 }
  0x9d   :  { %788 = vmatprep.subr.bf16.mxu0 %v998_v28 }
 0x152   :  { %v211_v41 = vpop.f32.mrb[0].mxu0 }
 0x153   :  { %v212_v42 = vadd.f32 %v211_v41, %v126_v39  ;;  %v213_v43 = vpop.f32.mrb[1].mxu0 }
 0x154   :  { %v214_v44 = vadd.f32 %v213_v43, %v130_v40  ;;  %v215_v45 = vpop.f32.mrb[2].mxu0 }
 0x155   :  { %v218_v46 = vmax.f32 %v212_v42, 0.0  ;;  %v216_v47 = vpop.f32.mrb[3].mxu0 }
 0x156   :  { %v219_v48 = vmax.f32 %v214_v44, 0.0 }
 0x157   :  { %v220_v50 = vpack.c.bf16 %v218_v46, %v218_v46 }
 0x158   :  { %v221_v49 = vpack.c.bf16 %v219_v48, %v219_v48 }
 0x15a   :  { %389 = vmatprep.mubr.bf16.mxu1 %v221_v49 }
 0x15b   :  { %390 = vmatmul.mubr.bf16.vlgmr.msra.gmra.mrb[0].mxu1 %v220_v50 }
 0x15c   :  { %784 = vmatprep.mubr.msk.bf16.mxu1 %vm999_vm1, %v998_v28  ;;  %777 = vmatpush3.bf16.msra.mxu1 %v843_v53 }
 0x15d   :  { %778 = vmatprep.subr.bf16.mxu1 %v998_v28 }
 0x160   :  { %779 = vmatpush3.bf16.msra.mxu1 %v844_v54 }
 0x161   :  { %780 = vmatprep.subr.bf16.mxu1 %v998_v28 }
 0x164   :  { %781 = vmatpush3.bf16.msra.mxu1 %v845_v0 }
 0x165   :  { %782 = vmatprep.subr.bf16.mxu1 %v998_v28 }
 0x168   :  { %783 = vmatpush3.bf16.msra.mxu1 %v846_v1 }
 0x22e   :  { %v733_v55 = vpop.f32.mrb[0].mxu1 }
 0x22f   :  { %v734_v57 = vpop.f32.mrb[1].mxu1 }
 0x230   :  { %v735_v58 = vadd.f32 %v734_v57, %v733_v55  ;;  %v736_v59 = vpop.f32.mrb[2].mxu1 }
 0x231   :  { %v737_v60 = vpop.f32.mrb[3].mxu1 }
 0x232   :  { %v392_v61 = vadd.f32 %v735_v58, %v681_v56 }
 0x234   :  { %v397_v62 = vmax.f32 %v392_v61, 0.0 }
 0x236   :  { %v398_v63 = vpack.c.bf16 %v397_v62, %v397_v62 }
 0x238   :  { %773 = vmatmul.mubr.bf16.vlgmr.msra.gmra.mrb[4].mxu0 %v398_v63 }
 0x239   :  { %792 = vmatprep.mubr.msk.bf16.mxu0 %vm999_vm1, %v998_v28  ;;  %789 = vmatpush3.bf16.msra.mxu0 %v847_v2 }
 0x23a   :  { %790 = vmatprep.subr.bf16.mxu0 %v998_v28 }
 0x23d   :  { %791 = vmatpush3.bf16.msra.mxu0 %v848_v11 }
 0x30b   :  { %v504_v4 = vpop.f32.mrb[4].mxu0 }
 0x30c   :  { %v505_v5 = vadd.f32 %v698_v3, %v504_v4  ;;  %v774_v6 = vpop.f32.mrb[5].mxu0 }
 0x30d   :  { %v507_v7 = vpop.f32.mrb[6].mxu0 }
 0x30e   :  { %v510_v8 = vmax.f32 %v505_v5, 0.0  ;;  %v775_v9 = vpop.f32.mrb[7].mxu0 }
 0x310   :  { %v511_v10 = vpack.c.bf16 %v510_v8, %v510_v8 }
 0x312   :  { %785 = vmatmul.mubr.msk.bf16.vlgmr.msra.gmra.mrb[4].mxu1 %vm173_vm0, %v511_v10 }
 0x3e5   :  { %v588_v13 = vpop.f32.mrb[4].mxu1 }
 0x3e6   :  { %v589_v14 = vadd.f32 %v707_v12, %v588_v13  ;;  %v786_v15 = vpop.f32.mrb[5].mxu1 }
 0x3e7   :  { %v591_v16 = vpop.f32.mrb[6].mxu1 }
 0x3e8   :  { %v594_v17 = vmax.f32 %v589_v14, 0.0  ;;  %v787_v18 = vpop.f32.mrb[7].mxu1 }
 0x3ea   :  { %v595_v19 = vpack.c.bf16 %v594_v17, %v594_v17 }
 0x3ec   :  { %793 = vmatmul.mubr.msk.bf16.vlgmr.msra.gmra.mrb[8].mxu0 %vm619_vm2, %v595_v19 }
 0x4bf   :  { %v657_v21 = vpop.f32.mrb[8].mxu0 }
 0x4c0   :  { %v658_v22 = vadd.f32 %v713_v20, %v657_v21  ;;  %v794_v23 = vpop.f32.mrb[9].mxu0 }
 0x4c1   :  { %v660_v24 = vpop.f32.mrb[10].mxu0 }
 0x4c2   :  { %663 = vst [vmem:[%s1268_s11] sm:$0xff] %v658_v22  ;;  %v795_v25 = vpop.f32.mrb[11].mxu0 }
 0x4c3   :  { %668 = vsyncpa [#allocation3], 1 }
 0x4c4   :  { %669 = vsyncpa [#allocation5], 1 }
 0x4c5   :  { %670 = vsyncpa [#allocation8], 1 }
 0x4c6   :  { %671 = vsyncpa [#allocation11], 1 }

</bundles_post_ra>
